<compile_context>
chip_gen: v5e
topology: v5e:2x2
jax: 0.10.0
libtpu: 0.0.40
codegen_flags: <defaults>
</compile_context>

<pallas_src>
import functools
import math

import numpy as np
import jax
import jax.numpy as jnp
from jax.experimental import pallas as pl
from jax.experimental.pallas import tpu as pltpu


# ----------------------------- Pallas kernel ------------------------------

def _fused_conv3x3_kernel(w_ref, xa_ref, xb_ref, o_ref, *, wp, tm):
    """One lane tile of the dynamic-weight 3x3 conv, im2col fused.

    w_ref : (9, S*Cout, C)  bf16  generated conv weights, tap-major, resident
    xa_ref: (C, TM)         bf16  lane tile of the zero-padded flat activation
    xb_ref: (C, HALO128)    bf16  lookahead (halo) chunk of the same array
    o_ref : (S*Cout, TM)    bf16/f32 lane-dense output tile

    Flat column r of the padded activation corresponds to (n, i, j) with
    i in [0, H+2), j in [0, W+2), wp = W+2.  Conv tap (dy, dx) centred at
    (n, i, j) lives at column r + dy*wp + dx, so the 3x3 conv is 9
    accumulating matmuls against statically shifted slices of the window.
    """
    xw = jnp.concatenate([xa_ref[...], xb_ref[...]], axis=1)   # (C, TM+HALO128)
    acc = jnp.zeros(o_ref.shape, jnp.float32)
    for k in range(9):
        dy, dx = divmod(k, 3)
        shift = dy * wp + dx
        acc = acc + jnp.dot(w_ref[k], xw[:, shift:shift + tm],
                            preferred_element_type=jnp.float32)
    o_ref[...] = acc.astype(o_ref.dtype)


def _ceil_div(a, b):
    return -(-a // b)


def _pick_tile(length, halo128, cap=16384):
    """Lane tile: multiple of halo128 (itself a multiple of 128), <= ~cap, and
    >= 2 grid steps whenever the problem allows (v7x megacore split)."""
    unit = halo128
    steps = max(2, _ceil_div(length, cap))
    tm = unit * max(1, _ceil_div(length, unit * steps))
    return min(tm, unit * max(1, _ceil_div(cap, unit)))


def _wconv_stage_pallas(w3, x_cnhw, s_ceil, out_dtype, tile_cap=16384):
    """All S dynamic 3x3 convs of one Wconv stage in a single fused kernel.

    w3     : (9, S*Cout, C) bf16 tap-major generated weights
    x_cnhw : (C, N, H, W)   bf16 activations (channels leading)
    returns: (S, Cout, N, H, W) valid conv outputs, dtype=out_dtype
    """
    nine, s_cout, c_w = w3.shape
    c, n, h, w = x_cnhw.shape
    assert c == c_w and nine == 9
    cout = s_cout // s_ceil

    wp = w + 2
    halo = 2 * wp + 2                               # max tap shift (dy=dx=2)
    halo128 = 128 * _ceil_div(halo, 128)
    length = n * (h + 2) * wp                       # padded flat lane domain

    tm = _pick_tile(length, halo128, tile_cap)
    n_tiles = _ceil_div(length, tm)
    l_out = n_tiles * tm
    l_src = l_out + halo128

    # Zero-pad spatially (+1 ring) and along the flat tail (tile + halo).
    # Cheap: operates on the un-inflated bf16 activation (~1.3x its size).
    xp = jnp.pad(x_cnhw, ((0, 0), (0, 0), (1, 1), (1, 1)))
    xf = jnp.pad(xp.reshape(c, length), ((0, 0), (0, l_src - length)))

    out = pl.pallas_call(
        functools.partial(_fused_conv3x3_kernel, wp=wp, tm=tm),
        out_shape=jax.ShapeDtypeStruct((s_cout, l_out), out_dtype),
        grid=(n_tiles,),
        in_specs=[
            pl.BlockSpec((9, s_cout, c), lambda m: (0, 0, 0)),   # resident
            pl.BlockSpec((c, tm), lambda m: (0, m)),             # main tile
            pl.BlockSpec((c, halo128),                           # halo chunk
                         lambda m: (0, (m + 1) * (tm // halo128))),
        ],
        out_specs=pl.BlockSpec((s_cout, tm), lambda m: (0, m)),
        compiler_params=pltpu.CompilerParams(
            dimension_semantics=("parallel",),
            vmem_limit_bytes=32 * 1024 * 1024),
    )(w3, xf, xf)                                   # xf passed twice (read-only)

    # Strip the junk columns (padding ring + zero tail) of the lane domain.
    o = out[:, :length].reshape(s_ceil, cout, n, h + 2, wp)
    return o[:, :, :, :h, :w]


# ------------------------------- JAX glue ---------------------------------

def init_params(key, inC, outC):
    """Fea2Weight (Linear(1,256) -> ReLU -> Linear(256, 9*inC*outC)) + LayerNorm."""
    k1, k2, k3, k4, k5, k6 = jax.random.split(key, 6)
    hidden = 256
    out_feat = 3 * 3 * inC * outC
    return dict(
        w1=0.2 * jax.random.normal(k1, (1, hidden), jnp.float32),
        b1=0.1 * jax.random.normal(k2, (hidden,), jnp.float32),
        w2=0.05 * jax.random.normal(k3, (hidden, out_feat), jnp.float32),
        b2=0.05 * jax.random.normal(k4, (out_feat,), jnp.float32),
        ln_g=1.0 + 0.1 * jax.random.normal(k5, (inC, 3, 3), jnp.float32),
        ln_b=0.1 * jax.random.normal(k6, (inC, 3, 3), jnp.float32),
    )


def _gen_conv_weights_f32(scale_ceil, params, inC, outC, xp=jnp):
    """Fea2Weight MLP + LayerNorm([inC,3,3]) / inC -> (S, Co, Ci, 3, 3) f32.

    Works with xp=jnp (kernel path) or xp=np (reference path)."""
    t = (xp.arange(1, scale_ceil + 1, dtype=xp.float32)
         - math.ceil(scale_ceil / 2)) / scale_ceil
    feats = t[:, None]                                             # (S, 1)
    hid = xp.maximum(feats @ xp.asarray(params["w1"]) + xp.asarray(params["b1"]), 0.0)
    wflat = hid @ xp.asarray(params["w2"]) + xp.asarray(params["b2"])
    wt = wflat.reshape(scale_ceil, outC, inC, 3, 3)
    mean = wt.mean(axis=(2, 3, 4), keepdims=True)                  # biased var
    var = wt.var(axis=(2, 3, 4), keepdims=True)
    wt = (wt - mean) / xp.sqrt(var + 1e-5)
    wt = wt * xp.asarray(params["ln_g"])[None, None] + xp.asarray(params["ln_b"])[None, None]
    return wt / inC


def _weights_tap_major(w_sckk):
    """(S, Co, Ci, 3, 3) -> (9, S*Co, Ci), tap index k = dy*3 + dx."""
    s, co, ci = w_sckk.shape[0], w_sckk.shape[1], w_sckk.shape[2]
    return jnp.transpose(w_sckk, (3, 4, 0, 1, 2)).reshape(9, s * co, ci)


def make_keep_indices(inH, inW, scale_r, scale_floor, scale_ceil):
    """Torch PadSR.mask_made() factored into separable kept H / W indices."""
    frac = round(scale_r - scale_floor, 1)

    def axis_keep(nax):
        if frac != 0:
            add = math.ceil(nax * frac)
            idx = np.floor(np.arange(1, add + 1, dtype=np.float32)
                           / np.float32(frac) - 1.0).astype(np.int64)
            f = np.zeros((1, nax), np.uint8)
            f[0, idx] = 1
        else:
            f = np.zeros((0, nax), np.uint8)
        m = np.concatenate([np.ones((scale_floor, nax), np.uint8), f], 0).reshape(-1)
        return np.nonzero(m)[0].astype(np.int32)

    return axis_keep(inH), axis_keep(inW)


def padsr_forward(x_nchw, scale, params, inC):
    """PadSR(inC).forward(input, scale); outC = -1 so pad_W shares pad_H weights."""
    outC = inC
    n, c, in_h, in_w = x_nchw.shape
    assert c == inC
    scale_r = round(float(scale), 1)
    s_ceil = math.ceil(scale)
    s_floor = math.floor(scale)
    out_h = math.ceil(scale_r * in_h)
    out_w = math.ceil(scale_r * in_w)

    # Meta-MLP + LayerNorm weight generation (tiny; stays in XLA), tap-major.
    w3 = _weights_tap_major(
        _gen_conv_weights_f32(s_ceil, params, inC, outC, xp=jnp)
    ).astype(jnp.bfloat16)                                          # (9, S*C, C)

    # bf16 once, channels leading so the kernel lane axis is the flat image.
    x_cnhw = jnp.transpose(x_nchw, (1, 0, 2, 3)).astype(jnp.bfloat16)

    # ---- pad_H: S convs in one fused kernel, interleave along H (s-minor) ----
    o1 = _wconv_stage_pallas(w3, x_cnhw, s_ceil, jnp.bfloat16)      # (S,C,N,H,W) bf16
    x2 = jnp.transpose(o1, (1, 2, 3, 0, 4)).reshape(outC, n, in_h * s_ceil, in_w)
    # TODO(synk): fold this interleave into a manual-DMA stage-2 gather to save
    # one HBM round trip of the intermediate.

    # ---- pad_W: S convs in one fused kernel, interleave along W (s-minor) ----
    o2 = _wconv_stage_pallas(w3, x2, s_ceil, jnp.float32)           # (S,C,N,HS,W) f32
    hs = in_h * s_ceil
    y = jnp.transpose(o2, (2, 1, 3, 4, 0)).reshape(n, outC, hs, in_w * s_ceil)

    # ---- mask_made + mask_select: separable take (H rows, then W cols) ----
    keep_h, keep_w = make_keep_indices(in_h, in_w, scale_r, s_floor, s_ceil)
    assert keep_h.shape[0] == out_h and keep_w.shape[0] == out_w
    y = jnp.take(y, jnp.asarray(keep_h), axis=2)
    y = jnp.take(y, jnp.asarray(keep_w), axis=3)
    return y                                                        # (N, C, outH, outW)


# --------------------- float32 numpy reference (ground truth) ---------------

def _ref_conv3x3_same(x, w):
    """conv2d(x, w, padding=1) cross-correlation, float32."""
    n, c, h, wd = x.shape
    xp = np.pad(x, ((0, 0), (0, 0), (1, 1), (1, 1)))
    out = np.zeros((n, w.shape[0], h, wd), np.float32)
    for dy in range(3):
        for dx in range(3):
            out += np.einsum("oc,nchw->nohw", w[:, :, dy, dx],
                             xp[:, :, dy:dy + h, dx:dx + wd])
    return out


def padsr_reference(x_nchw, scale, params, inC):
    """Pure-numpy float32 replica of the torch PadSR forward."""
    x = np.asarray(x_nchw, np.float32)
    n, c, in_h, in_w = x.shape
    scale_r = round(float(scale), 1)
    s_ceil = math.ceil(scale)
    s_floor = math.floor(scale)
    out_h = math.ceil(scale_r * in_h)
    out_w = math.ceil(scale_r * in_w)
    w = np.asarray(_gen_conv_weights_f32(s_ceil, params, inC, inC, xp=np), np.float32)
    # pad_H: stack(dim=3) -> (N,C,H,S,W) -> (N,C,H*S,W)
    o1 = np.stack([_ref_conv3x3_same(x, w[s]) for s in range(s_ceil)], axis=3)
    x2 = o1.reshape(n, c, in_h * s_ceil, in_w)
    # pad_W (shared weights): stack(dim=-1) -> (N,C,HS,W,S) -> flat
    o2 = np.stack([_ref_conv3x3_same(x2, w[s]) for s in range(s_ceil)], axis=-1)
    flat = o2.reshape(n, c, -1)
    keep_h, keep_w = make_keep_indices(in_h, in_w, scale_r, s_floor, s_ceil)
    mask2d = np.zeros((in_h * s_ceil, in_w * s_ceil), bool)
    mask2d[np.ix_(keep_h, keep_w)] = True
    out = flat[:, :, mask2d.reshape(-1)]
    return out.reshape(n, c, out_h, out_w)


# --------------------------------- main ------------------------------------

if __name__ == "__main__":
    inC = 4
    batch, in_h, in_w = 2, 16, 16
    scale = 1.5

    key = jax.random.PRNGKey(0)
    kx, kp = jax.random.split(key)
    x = jax.random.normal(kx, (batch, inC, in_h, in_w), jnp.float32)
    params = init_params(kp, inC, inC)

    out = padsr_forward(x, scale, params, inC)
    out = jax.block_until_ready(out)

    expected = (batch, inC, math.ceil(scale * in_h), math.ceil(scale * in_w))
    assert out.shape == expected, (out.shape, expected)
    out_np = np.asarray(out)
    assert np.all(np.isfinite(out_np))

    # Value-level check against the float32 numpy replica of the torch forward
    # (guards interleave / mask ordering; tolerance covers bf16 operands).
    ref = padsr_reference(x, scale, params, inC)
    err = float(np.max(np.abs(out_np - ref)) / (np.max(np.abs(ref)) + 1e-6))
    assert err < 5e-2, f"max error relative to peak: {err:.4f}"

    print("KERNEL_OK")
</pallas_src>

<mosaic_0001>
module attributes {stable_mosaic.version = 11 : i64} {
  func.func @_fused_conv3x3_kernel(%arg0: i32, %arg1: memref<9x8x4xbf16, #tpu.memory_space<vmem>>, %arg2: memref<4x384xbf16, #tpu.memory_space<vmem>>, %arg3: memref<4x128xbf16, #tpu.memory_space<vmem>>, %arg4: memref<8x384xbf16, #tpu.memory_space<vmem>>) attributes {dimension_semantics = [#tpu.dimension_semantics<parallel>], iteration_bounds = array<i64: 2>, scalar_prefetch = 0 : i64, scratch_operands = 0 : i64, tpu.core_type = #tpu.core_type<tc>, window_params = [{pipeline_mode = #tpu.pipeline_mode<synchronous>, transform_indices = @transform_0, window_bounds = array<i64: 9, 8, 4>}, {transform_indices = @transform_1, window_bounds = array<i64: 4, 384>}, {transform_indices = @transform_2, window_bounds = array<i64: 4, 128>}, {transform_indices = @transform_3, window_bounds = array<i64: 8, 384>}]} {
    %c0 = arith.constant 0 : index
    %c0_0 = arith.constant 0 : index
    %0 = vector.load %arg2[%c0, %c0_0] : memref<4x384xbf16, #tpu.memory_space<vmem>>, vector<4x384xbf16>
    %c0_1 = arith.constant 0 : index
    %c0_2 = arith.constant 0 : index
    %1 = vector.load %arg3[%c0_1, %c0_2] : memref<4x128xbf16, #tpu.memory_space<vmem>>, vector<4x128xbf16>
    %2 = tpu.concatenate %0, %1 in 1 : vector<4x384xbf16>, vector<4x128xbf16> -> vector<4x512xbf16>
    %cst = arith.constant 0.000000e+00 : f32
    %3 = vector.broadcast %cst : f32 to vector<8x384xf32>
    %c0_3 = arith.constant 0 : index
    %c0_4 = arith.constant 0 : index
    %c0_5 = arith.constant 0 : index
    %4 = vector.load %arg1[%c0_3, %c0_4, %c0_5] : memref<9x8x4xbf16, #tpu.memory_space<vmem>>, vector<1x8x4xbf16>
    %5 = vector.shape_cast %4 : vector<1x8x4xbf16> to vector<8x4xbf16>
    %6 = vector.extract_strided_slice %2 {offsets = [0, 0], sizes = [4, 384], strides = [1, 1]} : vector<4x512xbf16> to vector<4x384xbf16>
    %cst_6 = arith.constant dense<0.000000e+00> : vector<8x384xf32>
    %7 = tpu.matmul %5, %6, %cst_6 {dimension_numbers = #tpu.dot_dimension_numbers<[1], [0], [0], [1], [0, 0, 1, 1], [], []>} : vector<8x4xbf16>, vector<4x384xbf16>, vector<8x384xf32> -> vector<8x384xf32>
    %8 = arith.addf %3, %7 : vector<8x384xf32>
    %c1 = arith.constant 1 : index
    %c0_7 = arith.constant 0 : index
    %c0_8 = arith.constant 0 : index
    %9 = vector.load %arg1[%c1, %c0_7, %c0_8] : memref<9x8x4xbf16, #tpu.memory_space<vmem>>, vector<1x8x4xbf16>
    %10 = vector.shape_cast %9 : vector<1x8x4xbf16> to vector<8x4xbf16>
    %11 = vector.extract_strided_slice %2 {offsets = [0, 1], sizes = [4, 384], strides = [1, 1]} : vector<4x512xbf16> to vector<4x384xbf16>
    %cst_9 = arith.constant dense<0.000000e+00> : vector<8x384xf32>
    %12 = tpu.matmul %10, %11, %cst_9 {dimension_numbers = #tpu.dot_dimension_numbers<[1], [0], [0], [1], [0, 0, 1, 1], [], []>} : vector<8x4xbf16>, vector<4x384xbf16>, vector<8x384xf32> -> vector<8x384xf32>
    %13 = arith.addf %8, %12 : vector<8x384xf32>
    %c2 = arith.constant 2 : index
    %c0_10 = arith.constant 0 : index
    %c0_11 = arith.constant 0 : index
    %14 = vector.load %arg1[%c2, %c0_10, %c0_11] : memref<9x8x4xbf16, #tpu.memory_space<vmem>>, vector<1x8x4xbf16>
    %15 = vector.shape_cast %14 : vector<1x8x4xbf16> to vector<8x4xbf16>
    %16 = vector.extract_strided_slice %2 {offsets = [0, 2], sizes = [4, 384], strides = [1, 1]} : vector<4x512xbf16> to vector<4x384xbf16>
    %cst_12 = arith.constant dense<0.000000e+00> : vector<8x384xf32>
    %17 = tpu.matmul %15, %16, %cst_12 {dimension_numbers = #tpu.dot_dimension_numbers<[1], [0], [0], [1], [0, 0, 1, 1], [], []>} : vector<8x4xbf16>, vector<4x384xbf16>, vector<8x384xf32> -> vector<8x384xf32>
    %18 = arith.addf %13, %17 : vector<8x384xf32>
    %c3 = arith.constant 3 : index
    %c0_13 = arith.constant 0 : index
    %c0_14 = arith.constant 0 : index
    %19 = vector.load %arg1[%c3, %c0_13, %c0_14] : memref<9x8x4xbf16, #tpu.memory_space<vmem>>, vector<1x8x4xbf16>
    %20 = vector.shape_cast %19 : vector<1x8x4xbf16> to vector<8x4xbf16>
    %21 = vector.extract_strided_slice %2 {offsets = [0, 18], sizes = [4, 384], strides = [1, 1]} : vector<4x512xbf16> to vector<4x384xbf16>
    %cst_15 = arith.constant dense<0.000000e+00> : vector<8x384xf32>
    %22 = tpu.matmul %20, %21, %cst_15 {dimension_numbers = #tpu.dot_dimension_numbers<[1], [0], [0], [1], [0, 0, 1, 1], [], []>} : vector<8x4xbf16>, vector<4x384xbf16>, vector<8x384xf32> -> vector<8x384xf32>
    %23 = arith.addf %18, %22 : vector<8x384xf32>
    %c4 = arith.constant 4 : index
    %c0_16 = arith.constant 0 : index
    %c0_17 = arith.constant 0 : index
    %24 = vector.load %arg1[%c4, %c0_16, %c0_17] : memref<9x8x4xbf16, #tpu.memory_space<vmem>>, vector<1x8x4xbf16>
    %25 = vector.shape_cast %24 : vector<1x8x4xbf16> to vector<8x4xbf16>
    %26 = vector.extract_strided_slice %2 {offsets = [0, 19], sizes = [4, 384], strides = [1, 1]} : vector<4x512xbf16> to vector<4x384xbf16>
    %cst_18 = arith.constant dense<0.000000e+00> : vector<8x384xf32>
    %27 = tpu.matmul %25, %26, %cst_18 {dimension_numbers = #tpu.dot_dimension_numbers<[1], [0], [0], [1], [0, 0, 1, 1], [], []>} : vector<8x4xbf16>, vector<4x384xbf16>, vector<8x384xf32> -> vector<8x384xf32>
    %28 = arith.addf %23, %27 : vector<8x384xf32>
    %c5 = arith.constant 5 : index
    %c0_19 = arith.constant 0 : index
    %c0_20 = arith.constant 0 : index
    %29 = vector.load %arg1[%c5, %c0_19, %c0_20] : memref<9x8x4xbf16, #tpu.memory_space<vmem>>, vector<1x8x4xbf16>
    %30 = vector.shape_cast %29 : vector<1x8x4xbf16> to vector<8x4xbf16>
    %31 = vector.extract_strided_slice %2 {offsets = [0, 20], sizes = [4, 384], strides = [1, 1]} : vector<4x512xbf16> to vector<4x384xbf16>
    %cst_21 = arith.constant dense<0.000000e+00> : vector<8x384xf32>
    %32 = tpu.matmul %30, %31, %cst_21 {dimension_numbers = #tpu.dot_dimension_numbers<[1], [0], [0], [1], [0, 0, 1, 1], [], []>} : vector<8x4xbf16>, vector<4x384xbf16>, vector<8x384xf32> -> vector<8x384xf32>
    %33 = arith.addf %28, %32 : vector<8x384xf32>
    %c6 = arith.constant 6 : index
    %c0_22 = arith.constant 0 : index
    %c0_23 = arith.constant 0 : index
    %34 = vector.load %arg1[%c6, %c0_22, %c0_23] : memref<9x8x4xbf16, #tpu.memory_space<vmem>>, vector<1x8x4xbf16>
    %35 = vector.shape_cast %34 : vector<1x8x4xbf16> to vector<8x4xbf16>
    %36 = vector.extract_strided_slice %2 {offsets = [0, 36], sizes = [4, 384], strides = [1, 1]} : vector<4x512xbf16> to vector<4x384xbf16>
    %cst_24 = arith.constant dense<0.000000e+00> : vector<8x384xf32>
    %37 = tpu.matmul %35, %36, %cst_24 {dimension_numbers = #tpu.dot_dimension_numbers<[1], [0], [0], [1], [0, 0, 1, 1], [], []>} : vector<8x4xbf16>, vector<4x384xbf16>, vector<8x384xf32> -> vector<8x384xf32>
    %38 = arith.addf %33, %37 : vector<8x384xf32>
    %c7 = arith.constant 7 : index
    %c0_25 = arith.constant 0 : index
    %c0_26 = arith.constant 0 : index
    %39 = vector.load %arg1[%c7, %c0_25, %c0_26] : memref<9x8x4xbf16, #tpu.memory_space<vmem>>, vector<1x8x4xbf16>
    %40 = vector.shape_cast %39 : vector<1x8x4xbf16> to vector<8x4xbf16>
    %41 = vector.extract_strided_slice %2 {offsets = [0, 37], sizes = [4, 384], strides = [1, 1]} : vector<4x512xbf16> to vector<4x384xbf16>
    %cst_27 = arith.constant dense<0.000000e+00> : vector<8x384xf32>
    %42 = tpu.matmul %40, %41, %cst_27 {dimension_numbers = #tpu.dot_dimension_numbers<[1], [0], [0], [1], [0, 0, 1, 1], [], []>} : vector<8x4xbf16>, vector<4x384xbf16>, vector<8x384xf32> -> vector<8x384xf32>
    %43 = arith.addf %38, %42 : vector<8x384xf32>
    %c8 = arith.constant 8 : index
    %c0_28 = arith.constant 0 : index
    %c0_29 = arith.constant 0 : index
    %44 = vector.load %arg1[%c8, %c0_28, %c0_29] : memref<9x8x4xbf16, #tpu.memory_space<vmem>>, vector<1x8x4xbf16>
    %45 = vector.shape_cast %44 : vector<1x8x4xbf16> to vector<8x4xbf16>
    %46 = vector.extract_strided_slice %2 {offsets = [0, 38], sizes = [4, 384], strides = [1, 1]} : vector<4x512xbf16> to vector<4x384xbf16>
    %cst_30 = arith.constant dense<0.000000e+00> : vector<8x384xf32>
    %47 = tpu.matmul %45, %46, %cst_30 {dimension_numbers = #tpu.dot_dimension_numbers<[1], [0], [0], [1], [0, 0, 1, 1], [], []>} : vector<8x4xbf16>, vector<4x384xbf16>, vector<8x384xf32> -> vector<8x384xf32>
    %48 = arith.addf %43, %47 : vector<8x384xf32>
    %49 = arith.truncf %48 : vector<8x384xf32> to vector<8x384xbf16>
    %c0_31 = arith.constant 0 : index
    %c0_32 = arith.constant 0 : index
    %50 = vector.load %arg4[%c0_31, %c0_32] : memref<8x384xbf16, #tpu.memory_space<vmem>>, vector<8x384xbf16>
    tpu.vector_store %arg4[%c0_31, %c0_32], %49 {strides = array<i32>} : memref<8x384xbf16, #tpu.memory_space<vmem>>, vector<8x384xbf16>,
    return
  }
  func.func @transform_0(%arg0: i32) -> (i32, i32, i32) {
    %c0_i32 = arith.constant 0 : i32
    %c0_i32_0 = arith.constant 0 : i32
    %c0_i32_1 = arith.constant 0 : i32
    %c0_i32_2 = arith.constant 0 : i32
    return %c0_i32, %c0_i32_0, %c0_i32_1 : i32, i32, i32
  }
  func.func @transform_1(%arg0: i32) -> (i32, i32) {
    %c0_i32 = arith.constant 0 : i32
    %c0_i32_0 = arith.constant 0 : i32
    return %c0_i32, %arg0 : i32, i32
  }
  func.func @transform_2(%arg0: i32) -> (i32, i32) {
    %c1_i32 = arith.constant 1 : i32
    %0 = arith.addi %arg0, %c1_i32 : i32
    %c3_i32 = arith.constant 3 : i32
    %1 = arith.muli %0, %c3_i32 : i32
    %c0_i32 = arith.constant 0 : i32
    %c0_i32_0 = arith.constant 0 : i32
    return %c0_i32, %1 : i32, i32
  }
  func.func @transform_3(%arg0: i32) -> (i32, i32) {
    %c0_i32 = arith.constant 0 : i32
    %c0_i32_0 = arith.constant 0 : i32
    return %c0_i32, %arg0 : i32, i32
  }
}

</mosaic_0001>

<bundles_post_ra>
// kernel: tpu_custom_call.1
= control target key start
LH: loop header
LB: loop body
LE: loop exit
PB: predicated region body
PF: predicated region fallthrough
CT: control target
= control target key end

     0   :  { %8 = vsyncpa [#allocation3], 0  ;;  %s1306_s0 = inlined_call_operand.vmem [shape: bf16[9,8,4], index: 0, kind: input, shape index: {}]   ;;  %s1307_s1 = inlined_call_operand.vmem [shape: bf16[4,896], index: 1, kind: input, shape index: {}]   ;;  %s1308_s2 = inlined_call_operand.vmem [shape: bf16[4,896], index: 2, kind: input, shape index: {}]   ;;  %s1309_s3 = inlined_call_operand.hbm [shape: bf16[8,768], index: 3, kind: output, shape index: {}]  }
   0x1   :  { %10 = vsyncpa [#allocation3 + $0x1], 0  ;;  %s1104_s12 = smov 0   ;;  %s1106_s13 = smov 0  }
   0x2   :  { %s1108_s14 = smov 0   ;;  %s1110_s15 = smov 0  }
   0x3 LB: > { %s1125_s16 = sadd.s32 4294967295, %s1074_s15   ;;  %s919_s17 = sadd.s32 4294967294, %s1074_s15   ;;  %s1074_s15 = sphi %s1110_s15, %s1315_s15   ;;  %s1070_s14 = sphi %s1108_s14, %s1314_s14   ;;  %s1066_s13 = sphi %s1106_s13, %s1313_s13   ;;  %s1062_s12 = sphi %s1104_s12, %s1312_s12  }
   0x4   : > { %s1129_s18 = sadd.s32 1, %s1074_s15   ;;  %s100_s19 = sadd.s32 1, %s1070_s14 }
   0x5   : > { %s97_s20 = ssub.s32 %s1074_s15, %s1129_s18  ;;  %p110_p0 = scmp.ne.s32.totalorder %s1070_s14, %s1066_s13 }
   0x6   : > { %p98_p1 = scmp.eq.s32.totalorder %s97_s20, 0  ;;  %p111_p2 = scmp.eq.s32.totalorder %s1125_s16, 1 }
   0x7   : > { %p116_p3 = scmp.ne.s32.totalorder %s1066_s13, %s1062_s12  ;;  %p117_p4 = scmp.eq.s32.totalorder %s919_s17, 1 }
   0x8   : > { %s1140_s21 = scalar_select %p98_p1, %s1070_s14, %s100_s19  }
   0x9   : > { %p1142_p5 = por %p111_p2, %p110_p0  ;;  %p1146_p6 = por %p117_p4, %p116_p3 }
   0xa   : > { %p922_p7 = scmp.ge.s32.totalorder %s1074_s15, 1  ;;  %p166_p8 = scmp.lt.s32.totalorder %s1074_s15, 3 }
   0xc   : > { %p167_p9 = pnand %p922_p7, %p166_p8 }
   0xd   : > { %s200_s24 = smul.u32 (!%p167_p9), 3, %s1125_s16  ;;  %s214_s25 = sadd.s32 (!%p167_p9), 1, %s1125_s16 }
   0xe   : > { %170 = sbr.rel (%p167_p9) target bundleno = 398 (0x18e), region = 32  ;;  %s1076_s5 = smov (!%p167_p9), 127  }
   0xf   : > { %p205_p10 = scmp.lt.s32.totalorder (!%p167_p9), %s200_s24, 6  ;;  %s215_s26 = smul.u32 (!%p167_p9), 3, %s214_s25 }
  0x10   : > { %s1077_s6 = smov (!%p167_p9), 126   ;;  %s1078_s10 = smov (!%p167_p9), 110  }
  0x11   : > { %p216_p11 = scmp.lt.s32.totalorder (!%p167_p9), %s215_s26, 6  ;;  %s1079_s11 = smov (!%p167_p9), 109  }
  0x12   : > { %s1080_s17 = smov (!%p167_p9), 108   ;;  %s1081_s19 = smov (!%p167_p9), 92  }
  0x13   : > { %s1317_s24 = smov (!%p205_p10, %s200_s24), 6  ;;  %s1319_s26 = smov (!%p216_p11, %s215_s26), 6  ;;  %vm254_vm0 = vcmask 1041408   ;;  %v234_v6 = vld [vmem:[%s1306_s0] sm:$0xf]  ;;  %vm250_vm1 = vcmask 31744  }
  0x14   : > { %s923_s27 = sshll.u32 %s1317_s24, 1  ;;  %s924_s4 = sshll.u32 %s1319_s26, 1  ;;  %vm361_vm2 = vcmask 1031168   ;;  %vm246_vm3 = vcmask 1039360   ;;  %v925_v25 = vld [vmem:[%s1306_s0 + $0x4] sm:$0xf] }
  0x15   : > { %s208_s30 = scalar_lea.vmem %s1307_s1, %s923_s27  ;;  %s219_s9 = scalar_lea.vmem %s1308_s2, %s924_s4  ;;  %vm429_vm4 = vcmask 900096   ;;  %v932_v35 = vld [vmem:[%s1306_s0 + $0x8] sm:$0xf]  ;;  %vm497_vm5 = vcmask 891904   ;;  %v936_v48 = vld [vmem:[%s1306_s0 + $0xc] sm:$0xf] }
  0x16   : > { %v224_v0 = vld [vmem:[%s208_s30] sm:$0x3f]  ;;  %s1082_s20 = smov 91   ;;  %s1083_s24 = smov 90   ;;  %vm565_vm6 = vcmask 883712   ;;  %vm633_vm7 = vcmask 752640  }
  0x17   : > { %227 = vst [vmem:[#allocation1] ss:$4 sm:$0xff] %v224_v0  ;;  %v225_v3 = vld [vmem:[%s219_s9] sm:$0x3]  ;;  %v944_v0 = vld [vmem:[%s1306_s0 + $0x14] sm:$0xf] }
  0x18   : > { %vm701_vm8 = vcmask 744448   ;;  %vm769_vm9 = vcmask 736256   ;;  %s197_s25 = sand.u32 1, %s1066_s13   ;;  %s963_s27 = smul.u32 12, %s1125_s16 }
  0x19   : > { %s964_s26 = smul.u32 12, %s197_s25  ;;  %s832_s16 = scalar_lea.sflag [#allocation3], %s197_s25 }
  0x1a   : > { %s843_s30 = scalar_lea.hbm %s1309_s3, %s963_s27 }
  0x1b   : > { %s199_s4 = scalar_lea.vmem [#allocation2], %s964_s26 }
  0x1e   : > { %v1157_v1 = vld.sshfl [vmem:[#allocation1 + $0x10] sm:$0xff pattern:$0x73625140]  ;;  %v228_v2 = vld.sshfl [vmem:[#allocation1] sm:$0xff pattern:$0x73625140] }
  0x1f   : > { %242 = vrot.lane.b32.xlu0 %v1157_v1, %s1076_s5  ;;  %238 = vrot.lane.b32.xlu1 %v228_v2, %s1076_s5  ;;  %v230_v4 = vld.sshfl [vmem:[#allocation1 + $0x8] sm:$0xff pattern:$0x73625140]  ;;  %v306_v5 = vsel %vm254_vm0, %v228_v2, 0  ;;  %v310_v24 = vsel %vm254_vm0, %v1157_v1, 0 }
  0x20   : > { %353 = vrot.lane.b32.xlu2 %v228_v2, %s1077_s6  ;;  %319 = vmatpush.bf16.msra.mxu3 %v306_v5  ;;  %v308_v20 = vsel %vm254_vm0, %v230_v4, 0 }
  0x23   : > { %929 = vmatmul.msk.bf16.vlgmr.msra.gmra.mxu3 %vm250_vm1, %v234_v6 }
  0x27   : > { %244 = vrot.lane.b32.xlu0 %v225_v3, %s1076_s5  ;;  %240 = vrot.lane.b32.xlu1 %v230_v4, %s1076_s5  ;;  %s845_s5 = sshll.u32 %s199_s4, 4  ;;  %s846_s5 = int_to_ptr.vmem [resolvable:$true] %s845_s5 }
  0x28   : > { %355 = vrot.lane.b32.xlu2 %v230_v4, %s1077_s6 }
  0x2f   : > { %357 = vrot.lane.b32.xlu0 %v1157_v1, %s1077_s6  ;;  %423 = vrot.lane.b32.xlu1 %v230_v4, %s1078_s10 }
  0x30   : > { %425 = vrot.lane.b32.xlu2 %v1157_v1, %s1078_s10 }
  0x37   : > { %359 = vrot.lane.b32.xlu0 %v225_v3, %s1077_s6  ;;  %421 = vrot.lane.b32.xlu1 %v228_v2, %s1078_s10  ;;  %s847_s6 = sshll.u32 %s843_s30, 4  ;;  %s848_s6 = int_to_ptr.hbm [resolvable:$true] %s847_s6 }
  0x38   : > { %427 = vrot.lane.b32.xlu2 %v225_v3, %s1078_s10  ;;  %s1026_s7 = sshra.s32 %s848_s6, 4  ;;  %s1027_s7 = int_to_ptr.hbm [resolvable:$true] %s1026_s7 }
  0x39   : > { %s1028_s8 = scalar_lea.hbm %s1027_s7, 12  ;;  %p1033_p1 = scmp.lt.s32.totalorder %s1027_s7, %s1309_s3 }
  0x3a   : > { %p1029_p12 = scmp.ne.s32.totalorder %s1027_s7, %s1028_s8 }
  0x3c   : > { %p1030_p13 = pnand %p1029_p12, %p1142_p5 }
  0x3e   : > { %p1031_p0 = pneg %p1030_p13 }
  0x3f   : > { %493 = vrot.lane.b32.xlu0 %v1157_v1, %s1079_s11  ;;  %495 = vrot.lane.b32.xlu1 %v225_v3, %s1079_s11 }
  0x40   : > { %489 = vrot.lane.b32.xlu2 %v228_v2, %s1079_s11 }
  0x47   : > { %491 = vrot.lane.b32.xlu0 %v230_v4, %s1079_s11  ;;  %557 = vrot.lane.b32.xlu1 %v228_v2, %s1080_s17  ;;  %s1032_s11 = scalar_lea.hbm %s1309_s3, 24 }
  0x48   : > { %559 = vrot.lane.b32.xlu2 %v230_v4, %s1080_s17  ;;  %p1034_p2 = scmp.lt.s32.totalorder %s1032_s11, %s1028_s8 }
  0x4a   : > { %p1035_p3 = por %p1034_p2, %p1033_p1 }
  0x4c   : > { %p1036_p4 = pnand %p1035_p3, %p1031_p0 }
  0x4f   : > { %625 = vrot.lane.b32.xlu0 %v228_v2, %s1081_s19  ;;  %627 = vrot.lane.b32.xlu1 %v230_v4, %s1081_s19 }
  0x50   : > { %561 = vrot.lane.b32.xlu2 %v1157_v1, %s1080_s17 }
  0x57   : > { %563 = vrot.lane.b32.xlu0 %v225_v3, %s1080_s17  ;;  %629 = vrot.lane.b32.xlu1 %v1157_v1, %s1081_s19 }
  0x58   : > { %695 = vrot.lane.b32.xlu2 %v230_v4, %s1082_s20 }
  0x5f   : > { %697 = vrot.lane.b32.xlu0 %v1157_v1, %s1082_s20  ;;  %631 = vrot.lane.b32.xlu1 %v225_v3, %s1081_s19 }
  0x60   : > { %693 = vrot.lane.b32.xlu2 %v228_v2, %s1082_s20 }
  0x67   : > { %699 = vrot.lane.b32.xlu0 %v225_v3, %s1082_s20  ;;  %765 = vrot.lane.b32.xlu1 %v1157_v1, %s1083_s24 }
  0x68   : > { %767 = vrot.lane.b32.xlu2 %v225_v3, %s1083_s24 }
  0x6f   : > { %763 = vrot.lane.b32.xlu1 %v230_v4, %s1083_s24  ;;  %761 = vrot.lane.b32.xlu0 %v228_v2, %s1083_s24 }
  0x7a   : > { %v354_v7 = vpop.permute.xlu2 %353 }
  0x82   : > { %v356_v8 = vpop.permute.xlu2 %355 }
  0x83   : > { %v362_v12 = vsel %vm361_vm2, %v354_v7, %v356_v8 }
  0x84   : > { %v369_v16 = vsel %vm254_vm0, %v362_v12, 0 }
  0x8a   : > { %v426_v9 = vpop.permute.xlu2 %425 }
  0x91   : > { %v243_v10 = vpop.permute.xlu0 %242  ;;  %v239_v11 = vpop.permute.xlu1 %238 }
  0x92   : > { %v428_v13 = vpop.permute.xlu2 %427 }
  0x93   : > { %v432_v26 = vsel %vm429_vm4, %v426_v9, %v428_v13 }
  0x94   : > { %v443_v32 = vsel %vm254_vm0, %v432_v26, 0 }
  0x99   : > { %v245_v14 = vpop.permute.xlu0 %244  ;;  %v241_v15 = vpop.permute.xlu1 %240 }
  0x9a   : > { %v247_v17 = vsel %vm246_vm3, %v239_v11, %v241_v15  ;;  %v248_v18 = vsel %vm246_vm3, %v241_v15, %v243_v10  ;;  %v249_v19 = vsel %vm246_vm3, %v243_v10, %v245_v14  ;;  %v490_v27 = vpop.permute.xlu2 %489 }
  0x9b   : > { %v256_v21 = vsel %vm254_vm0, %v247_v17, 0  ;;  %v259_v22 = vsel %vm254_vm0, %v248_v18, 0  ;;  %v262_v23 = vsel %vm254_vm0, %v249_v19, 0  ;;  %v948_v17 = vld [vmem:[%s1306_s0 + $0x18] sm:$0xf] }
  0x9c   : > { %271 = vmatpush.bf16.msra.mxu0 %v256_v21  ;;  %284 = vmatpush.bf16.msra.mxu1 %v259_v22 }
  0x9d   : > { %297 = vmatpush.bf16.msra.mxu2 %v262_v23 }
  0x9f   : > { %926 = vmatmul.msk.bf16.vlgmr.msra.gmra.mxu0 %vm250_vm1, %v925_v25  ;;  %927 = vmatmul.msk.bf16.vlgmr.msra.gmra.mxu1 %vm250_vm1, %v925_v25 }
  0xa0   : > { %332 = vmatpush.bf16.msrb.mxu0 %v308_v20  ;;  %345 = vmatpush.bf16.msrb.mxu1 %v310_v24 }
  0xa1   : > { %384 = vmatpush.bf16.msrb.mxu2 %v369_v16  ;;  %v358_v28 = vpop.permute.xlu0 %357  ;;  %v424_v29 = vpop.permute.xlu1 %423 }
  0xa2   : > { %928 = vmatmul.msk.bf16.vlgmr.msra.gmra.mxu2 %vm250_vm1, %v925_v25  ;;  %v431_v30 = vsel %vm429_vm4, %v424_v29, %v426_v9  ;;  %v363_v31 = vsel %vm361_vm2, %v356_v8, %v358_v28  ;;  %v560_v42 = vpop.permute.xlu2 %559  ;;  %v940_v9 = vld [vmem:[%s1306_s0 + $0x10] sm:$0xf] }
  0xa3   : > { %v440_v33 = vsel %vm254_vm0, %v431_v30, 0  ;;  %v372_v34 = vsel %vm254_vm0, %v363_v31, 0  ;;  %v952_v31 = vld [vmem:[%s1306_s0 + $0x1c] sm:$0xf] }
  0xa4   : > { %397 = vmatpush.bf16.msrb.mxu3 %v372_v34 }
  0xa5   : > { %465 = vmatpush.bf16.msra.mxu2 %v440_v33 }
  0xa6   : > { %v321_v33 = vpop.f32.mrf.mxu3 }
  0xa7   : > { %934 = vmatmul.msk.bf16.vlgmr.msrb.gmra.mxu3 %vm250_vm1, %v932_v35 }
  0xa8   : > { %478 = vmatpush.bf16.msra.mxu3 %v443_v32  ;;  %v956_v32 = vld [vmem:[%s1306_s0 + $0x20] sm:$0xf] }
  0xa9   : > { %v360_v36 = vpop.permute.xlu0 %359  ;;  %v422_v37 = vpop.permute.xlu1 %421 }
  0xaa   : > { %v364_v38 = vsel %vm361_vm2, %v358_v28, %v360_v36  ;;  %v430_v39 = vsel %vm429_vm4, %v422_v37, %v424_v29  ;;  %v562_v47 = vpop.permute.xlu2 %561 }
  0xab   : > { %v375_v40 = vsel %vm254_vm0, %v364_v38, 0  ;;  %v437_v41 = vsel %vm254_vm0, %v430_v39, 0  ;;  %v567_v54 = vsel %vm565_vm6, %v560_v42, %v562_v47 }
  0xac   : > { %410 = vmatpush.bf16.msra.mxu0 %v375_v40  ;;  %452 = vmatpush.bf16.msra.mxu1 %v437_v41  ;;  %v576_v58 = vsel %vm254_vm0, %v567_v54, 0 }
  0xae   : > { %v323_v34 = vpop.f32.mrf.mxu3 }
  0xaf   : > { %930 = vmatmul.msk.bf16.vlgmr.msrb.gmra.mxu0 %vm250_vm1, %v234_v6  ;;  %931 = vmatmul.msk.bf16.vlgmr.msrb.gmra.mxu1 %vm250_vm1, %v234_v6 }
  0xb1   : > { %v494_v43 = vpop.permute.xlu0 %493  ;;  %v496_v44 = vpop.permute.xlu1 %495 }
  0xb2   : > { %933 = vmatmul.msk.bf16.vlgmr.msrb.gmra.mxu2 %vm250_vm1, %v932_v35  ;;  %v500_v45 = vsel %vm497_vm5, %v494_v43, %v496_v44  ;;  %v696_v59 = vpop.permute.xlu2 %695 }
  0xb3   : > { %v511_v46 = vsel %vm254_vm0, %v500_v45, 0 }
  0xb4   : > { %546 = vmatpush.bf16.msrb.mxu2 %v511_v46 }
  0xb7   : > { %939 = vmatmul.msk.bf16.vlgmr.msra.gmra.mxu3 %vm250_vm1, %v936_v48 }
  0xb9   : > { %v492_v49 = vpop.permute.xlu0 %491  ;;  %v558_v50 = vpop.permute.xlu1 %557 }
  0xba   : > { %v499_v51 = vsel %vm497_vm5, %v492_v49, %v494_v43  ;;  %v498_v52 = vsel %vm497_vm5, %v490_v27, %v492_v49  ;;  %v566_v53 = vsel %vm565_vm6, %v558_v50, %v560_v42  ;;  %v694_v1 = vpop.permute.xlu2 %693 }
  0xbb   : > { %v508_v55 = vsel %vm254_vm0, %v499_v51, 0  ;;  %v505_v56 = vsel %vm254_vm0, %v498_v52, 0  ;;  %v573_v57 = vsel %vm254_vm0, %v566_v53, 0  ;;  %v702_v6 = vsel %vm701_vm8, %v694_v1, %v696_v59 }
  0xbc   : > { %533 = vmatpush.bf16.msrb.mxu1 %v508_v55  ;;  %520 = vmatpush.bf16.msrb.mxu0 %v505_v56  ;;  %v709_v10 = vsel %vm254_vm0, %v702_v6, 0 }
  0xbd   : > { %588 = vmatpush.bf16.msrb.mxu3 %v573_v57 }
  0xbf   : > { %935 = vmatmul.msk.bf16.vlgmr.msra.gmra.mxu0 %vm250_vm1, %v932_v35  ;;  %937 = vmatmul.msk.bf16.vlgmr.msra.gmra.mxu1 %vm250_vm1, %v936_v48 }
  0xc0   : > { %601 = vmatpush.bf16.msra.mxu0 %v576_v58 }
  0xc1   : > { %v626_v60 = vpop.permute.xlu0 %625  ;;  %v628_v61 = vpop.permute.xlu1 %627 }
  0xc2   : > { %938 = vmatmul.msk.bf16.vlgmr.msra.gmra.mxu2 %vm250_vm1, %v936_v48  ;;  %v634_v62 = vsel %vm633_vm7, %v626_v60, %v628_v61  ;;  %v768_v18 = vpop.permute.xlu2 %767 }
  0xc3   : > { %v641_v63 = vsel %vm254_vm0, %v634_v62, 0 }
  0xc4   : > { %656 = vmatpush.bf16.msra.mxu2 %v641_v63 }
  0xc7   : > { %945 = vmatmul.msk.bf16.vlgmr.msrb.gmra.mxu3 %vm250_vm1, %v944_v0 }
  0xc9   : > { %v564_v2 = vpop.permute.xlu0 %563  ;;  %v630_v3 = vpop.permute.xlu1 %629 }
  0xca   : > { %v568_v4 = vsel %vm565_vm6, %v562_v47, %v564_v2  ;;  %v635_v5 = vsel %vm633_vm7, %v628_v61, %v630_v3 }
  0xcb   : > { %v579_v7 = vsel %vm254_vm0, %v568_v4, 0  ;;  %v644_v8 = vsel %vm254_vm0, %v635_v5, 0 }
  0xcc   : > { %669 = vmatpush.bf16.msra.mxu3 %v644_v8  ;;  %614 = vmatpush.bf16.msra.mxu1 %v579_v7 }
  0xcf   : > { %941 = vmatmul.msk.bf16.vlgmr.msrb.gmra.mxu0 %vm250_vm1, %v940_v9  ;;  %942 = vmatmul.msk.bf16.vlgmr.msrb.gmra.mxu1 %vm250_vm1, %v940_v9 }
  0xd0   : > { %724 = vmatpush.bf16.msrb.mxu1 %v709_v10 }
  0xd1   : > { %v698_v11 = vpop.permute.xlu0 %697  ;;  %v632_v12 = vpop.permute.xlu1 %631 }
  0xd2   : > { %943 = vmatmul.msk.bf16.vlgmr.msrb.gmra.mxu2 %vm250_vm1, %v940_v9  ;;  %v703_v13 = vsel %vm701_vm8, %v696_v59, %v698_v11  ;;  %v636_v14 = vsel %vm633_vm7, %v630_v3, %v632_v12 }
  0xd3   : > { %v712_v15 = vsel %vm254_vm0, %v703_v13, 0  ;;  %v647_v16 = vsel %vm254_vm0, %v636_v14, 0 }
  0xd4   : > { %682 = vmatpush.bf16.msrb.mxu0 %v647_v16  ;;  %737 = vmatpush.bf16.msrb.mxu2 %v712_v15 }
  0xd7   : > { %950 = vmatmul.msk.bf16.vlgmr.msra.gmra.mxu3 %vm250_vm1, %v948_v17 }
  0xd9   : > { %v700_v19 = vpop.permute.xlu0 %699  ;;  %v766_v20 = vpop.permute.xlu1 %765 }
  0xda   : > { %v704_v21 = vsel %vm701_vm8, %v698_v11, %v700_v19  ;;  %v772_v23 = vsel %vm769_vm9, %v766_v20, %v768_v18 }
  0xdb   : > { %v715_v22 = vsel %vm254_vm0, %v704_v21, 0  ;;  %v783_v24 = vsel %vm254_vm0, %v772_v23, 0 }
  0xdc   : > { %750 = vmatpush.bf16.msrb.mxu3 %v715_v22 }
  0xdf   : > { %946 = vmatmul.msk.bf16.vlgmr.msra.gmra.mxu0 %vm250_vm1, %v944_v0  ;;  %947 = vmatmul.msk.bf16.vlgmr.msra.gmra.mxu1 %vm250_vm1, %v944_v0 }
  0xe1   : > { %v764_v25 = vpop.permute.xlu1 %763  ;;  %v762_v26 = vpop.permute.xlu0 %761 }
  0xe2   : > { %949 = vmatmul.msk.bf16.vlgmr.msra.gmra.mxu2 %vm250_vm1, %v948_v17  ;;  %v771_v27 = vsel %vm769_vm9, %v764_v25, %v766_v20  ;;  %v770_v28 = vsel %vm769_vm9, %v762_v26, %v764_v25 }
  0xe3   : > { %818 = vmatpush.bf16.msra.mxu2 %v783_v24  ;;  %v780_v29 = vsel %vm254_vm0, %v771_v27, 0  ;;  %v777_v30 = vsel %vm254_vm0, %v770_v28, 0 }
  0xe4   : > { %805 = vmatpush.bf16.msra.mxu1 %v780_v29  ;;  %792 = vmatpush.bf16.msra.mxu0 %v777_v30 }
  0xe7   : > { %955 = vmatmul.msk.bf16.vlgmr.msrb.gmra.mxu3 %vm250_vm1, %v952_v31 }
  0xef   : > { %951 = vmatmul.msk.bf16.vlgmr.msrb.gmra.mxu0 %vm250_vm1, %v948_v17  ;;  %953 = vmatmul.msk.bf16.vlgmr.msrb.gmra.mxu1 %vm250_vm1, %v952_v31 }
  0xf2   : > { %954 = vmatmul.msk.bf16.vlgmr.msrb.gmra.mxu2 %vm250_vm1, %v952_v31 }
  0xff   : > { %957 = vmatmul.msk.bf16.vlgmr.msra.gmra.mxu0 %vm250_vm1, %v956_v32  ;;  %958 = vmatmul.msk.bf16.vlgmr.msra.gmra.mxu1 %vm250_vm1, %v956_v32 }
 0x102   : > { %959 = vmatmul.msk.bf16.vlgmr.msra.gmra.mxu2 %vm250_vm1, %v956_v32 }
 0x11c   : > { %v273_v35 = vpop.f32.mrf.mxu0  ;;  %v286_v36 = vpop.f32.mrf.mxu1 }
 0x11d   : > { %v322_v37 = vadd.f32 %v321_v33, %v273_v35 }
 0x124   : > { %v275_v39 = vpop.f32.mrf.mxu0  ;;  %v288_v40 = vpop.f32.mrf.mxu1 }
 0x125   : > { %v299_v38 = vpop.f32.mrf.mxu2 }
 0x12a   : > { %v399_v41 = vpop.f32.mrf.mxu3 }
 0x12c   : > { %v334_v43 = vpop.f32.mrf.mxu0  ;;  %v347_v44 = vpop.f32.mrf.mxu1 }
 0x12d   : > { %v301_v42 = vpop.f32.mrf.mxu2  ;;  %v335_v45 = vadd.f32 %v334_v43, %v286_v36  ;;  %v348_v46 = vadd.f32 %v347_v44, %v299_v38 }
 0x12f   : > { %v417_v47 = vadd.f32 %v399_v41, %v335_v45 }
 0x132   : > { %v401_v48 = vpop.f32.mrf.mxu3 }
 0x134   : > { %v336_v50 = vpop.f32.mrf.mxu0  ;;  %v349_v51 = vpop.f32.mrf.mxu1 }
 0x135   : > { %v386_v49 = vpop.f32.mrf.mxu2 }
 0x136   : > { %v416_v16 = vadd.f32 %v386_v49, %v322_v37 }
 0x13a   : > { %v480_v52 = vpop.f32.mrf.mxu3 }
 0x13c   : > { %v412_v54 = vpop.f32.mrf.mxu0  ;;  %v454_v55 = vpop.f32.mrf.mxu1 }
 0x13d   : > { %v388_v53 = vpop.f32.mrf.mxu2  ;;  %v484_v17 = vadd.f32 %v454_v55, %v416_v16  ;;  %v418_v23 = vadd.f32 %v412_v54, %v348_v46 }
 0x13f   : > { %v486_v28 = vadd.f32 %v480_v52, %v418_v23 }
 0x142   : > { %v482_v56 = vpop.f32.mrf.mxu3 }
 0x144   : > { %v414_v58 = vpop.f32.mrf.mxu0  ;;  %v456_v59 = vpop.f32.mrf.mxu1 }
 0x145   : > { %v467_v57 = vpop.f32.mrf.mxu2 }
 0x146   : > { %v485_v18 = vadd.f32 %v467_v57, %v417_v47 }
 0x14a   : > { %v590_v60 = vpop.f32.mrf.mxu3 }
 0x14c   : > { %v522_v62 = vpop.f32.mrf.mxu0  ;;  %v535_v63 = vpop.f32.mrf.mxu1 }
 0x14d   : > { %v469_v61 = vpop.f32.mrf.mxu2  ;;  %v552_v20 = vadd.f32 %v522_v62, %v484_v17  ;;  %v553_v21 = vadd.f32 %v535_v63, %v485_v18 }
 0x14f   : > { %v620_v27 = vadd.f32 %v590_v60, %v552_v20 }
 0x152   : > { %v592_v0 = vpop.f32.mrf.mxu3 }
 0x154   : > { %v524_v2 = vpop.f32.mrf.mxu0  ;;  %v537_v3 = vpop.f32.mrf.mxu1 }
 0x155   : > { %v548_v1 = vpop.f32.mrf.mxu2 }
 0x156   : > { %v554_v31 = vadd.f32 %v548_v1, %v486_v28 }
 0x15a   : > { %v671_v4 = vpop.f32.mrf.mxu3 }
 0x15c   : > { %v603_v6 = vpop.f32.mrf.mxu0  ;;  %v616_v7 = vpop.f32.mrf.mxu1 }
 0x15d   : > { %v550_v5 = vpop.f32.mrf.mxu2  ;;  %v621_v26 = vadd.f32 %v603_v6, %v553_v21  ;;  %v622_v35 = vadd.f32 %v616_v7, %v554_v31 }
 0x15f   : > { %v689_v29 = vadd.f32 %v671_v4, %v621_v26 }
 0x162   : > { %v673_v8 = vpop.f32.mrf.mxu3 }
 0x164   : > { %v605_v10 = vpop.f32.mrf.mxu0  ;;  %v618_v11 = vpop.f32.mrf.mxu1 }
 0x165   : > { %v658_v9 = vpop.f32.mrf.mxu2 }
 0x166   : > { %v688_v30 = vadd.f32 %v658_v9, %v620_v27 }
 0x16a   : > { %v752_v12 = vpop.f32.mrf.mxu3 }
 0x16c   : > { %v684_v14 = vpop.f32.mrf.mxu0  ;;  %v726_v15 = vpop.f32.mrf.mxu1 }
 0x16d   : > { %v660_v13 = vpop.f32.mrf.mxu2  ;;  %v756_v32 = vadd.f32 %v726_v15, %v688_v30  ;;  %v690_v40 = vadd.f32 %v684_v14, %v622_v35 }
 0x16f   : > { %v758_v42 = vadd.f32 %v752_v12, %v690_v40 }
 0x172   : > { %v754_v19 = vpop.f32.mrf.mxu3 }
 0x174   : > { %v686_v24 = vpop.f32.mrf.mxu0  ;;  %v728_v25 = vpop.f32.mrf.mxu1 }
 0x175   : > { %v739_v22 = vpop.f32.mrf.mxu2 }
 0x176   : > { %v757_v33 = vadd.f32 %v739_v22, %v689_v29 }
 0x17c   : > { %v794_v36 = vpop.f32.mrf.mxu0  ;;  %v807_v37 = vpop.f32.mrf.mxu1 }
 0x17d   : > { %v741_v34 = vpop.f32.mrf.mxu2  ;;  %v824_v38 = vadd.f32 %v794_v36, %v756_v32  ;;  %v825_v39 = vadd.f32 %v807_v37, %v757_v33 }
 0x17f   : > { %v827_v41 = vpack.c.bf16 %v825_v39, %v824_v38 }
 0x181   : > { %829 = vst [vmem:[%s199_s4] sm:$0xff] %v827_v41 }
 0x184   : > { %v796_v45 = vpop.f32.mrf.mxu0  ;;  %v809_v46 = vpop.f32.mrf.mxu1 }
 0x185   : > { %v820_v43 = vpop.f32.mrf.mxu2 }
 0x186   : > { %v826_v44 = vadd.f32 %v820_v43, %v758_v42 }
 0x188   : > { %v828_v47 = vpack.c.bf16 %v826_v44, %v826_v44 }
 0x18a   : > { %830 = vst [vmem:[%s199_s4 + $0x8] sm:$0xf] %v828_v47 }
 0x18b   : > { %1039 = shalt.err (!%p1036_p4)
}
 0x18c   : > { %965 = dma.vmem_to_hbm [thread:$0]  (%p1142_p5), %s846_s5, 192, %s848_s6, %s832_s16  }
 0x18d   : > { %v822_v48 = vpop.f32.mrf.mxu2 }
 0x18e PF: > { %p971_p7 = scmp.ge.s32.totalorder %s1074_s15, 2  ;;  %s859_s20 = sand.u32 1, %s1062_s12  }
 0x18f   : > { %s860_s24 = scalar_lea.sflag [#allocation3], %s859_s20 }
 0x190   : > { %p968_p8 = pnand %p971_p7, %p1146_p6 }
 0x192   : > { %p969_p9 = pneg %p968_p8 }
 0x194   : > { %1057 = dma.done.wait (%p969_p9), %s860_s24, 192  }
 0x195   : > { %1059 = vsyncadd (%p969_p9), %s860_s24, 4294967104  ;;  %p13_p10 = scmp.ge.s32.totalorder %s1129_s18, 4   ;;  %s1312_s12 = smov %s1066_s13 }
 0x196   : > { %s1313_s13 = smov %s1070_s14  ;;  %s1314_s14 = smov %s1140_s21 }
 0x197   : > { %s1315_s15 = smov %s1129_s18  ;;  %15 = sbr.rel (!%p13_p10) target bundleno = 3 (0x3), region = 78 }
 0x19c   :  { %866 = vsyncpa [#allocation3], 1 }
 0x19d   :  { %868 = vsyncpa [#allocation3 + $0x1], 1 }

</bundles_post_ra>
